<compile_context>
chip_gen: v6e
topology: v6e:2x2x1
jax: 0.10.0
libtpu: 0.0.40
codegen_flags: <defaults>
</compile_context>

<pallas_src>
import jax
import jax.numpy as jnp
from jax.experimental import pallas as pl
from jax.experimental.pallas import tpu as pltpu


def _score_body(x_ref, we_ref, bias_ref, ws_ref, mask_ref, out_ref):
    # x_ref:    (TB, TL, I)     f32   embedding rows for this (batch, L) tile
    # we_ref:   (I, H_pad)      bf16  embedding half of attn weight (transposed)
    # bias_ref: (TB, 1, H_pad)  f32   per-batch bias = hidden @ W_h.T + b_attn
    # ws_ref:   (1, 1, H_pad)   bf16  score weight row
    # mask_ref: (TB, 1, TL)     int8  (masked variant only) 1 -> fill -1e12
    # out_ref:  (TB, 1, TL)     f32   lane-dense scores
    TB, TL, I = x_ref.shape
    H = we_ref.shape[1]

    # Stream f32 from HBM, cast to bf16 on-chip (no wrapper-side cast pass).
    x = x_ref[...].astype(jnp.bfloat16).reshape(TB * TL, I)            # free reshape
    h = jnp.dot(x, we_ref[...], preferred_element_type=jnp.float32)    # (TB*TL, H_pad)
    h = h.reshape(TB, TL, H) + bias_ref[...]                           # bias broadcast
    # f32 tanh then cast (works on every TPU gen).  On v6e/v7x, tanh((h).astype
    # (bf16)) halves this intermediate; kept f32 here for portability.
    h16 = jnp.tanh(h).astype(jnp.bfloat16)                             # (TB, TL, H_pad)

    # NT contraction (both minor dims contracted) -> MXU-native, no vxpose of
    # h16, and the (TB, 1, TL) result is lane-dense for an unmasked store.
    ws_b = jnp.broadcast_to(ws_ref[...], (TB, 1, H))
    s = jnp.einsum("bqh,bkh->bqk", ws_b, h16,
                   preferred_element_type=jnp.float32)                 # (TB, 1, TL)

    if mask_ref is not None:
        s = jnp.where(mask_ref[...] != 0, jnp.float32(-1e12), s)
    out_ref[...] = s


def _score_kernel(x_ref, we_ref, bias_ref, ws_ref, out_ref):
    _score_body(x_ref, we_ref, bias_ref, ws_ref, None, out_ref)


def _score_kernel_masked(x_ref, we_ref, bias_ref, ws_ref, mask_ref, out_ref):
    _score_body(x_ref, we_ref, bias_ref, ws_ref, mask_ref, out_ref)


def _round_up(x, m):
    return (x + m - 1) // m * m


def score_forward(hidden, num_embeddings, w_attn, b_attn, w_score, num_mask=None):
    """Pallas equivalent of Score.forward.

    hidden:         (B, 1, H) f32
    num_embeddings: (B, L, I) f32
    w_attn:         (H, H + I)  (nn.Linear layout: (out, in); input is [hidden | emb])
    b_attn:         (H,)
    w_score:        (1, H)
    num_mask:       optional (B, L) bool
    returns:        (B, L) float32
    """
    B, one, H = hidden.shape
    assert one == 1
    _, L, I = num_embeddings.shape

    # Split attn weight into hidden / embedding halves.
    W_h = w_attn[:, :H]                                  # (H, H)
    W_e = w_attn[:, H:]                                  # (H, I)

    # Fold the repeated-hidden contribution into a per-batch bias (tiny f32 GEMM).
    bias_b = hidden[:, 0, :] @ W_h.T + b_attn            # (B, H) f32

    # Pad H (lane dim of weights / bias / score row) to a multiple of 128.
    # Padded columns give tanh(0 + 0) = 0 and padded ws entries are 0 -> exact.
    H_pad = _round_up(H, 128)
    ph = H_pad - H
    we_p = jnp.pad(W_e.T, ((0, 0), (0, ph))).astype(jnp.bfloat16)          # (I, H_pad)
    bias_p = jnp.pad(bias_b, ((0, 0), (0, ph))).reshape(B, 1, H_pad)       # f32
    ws_p = jnp.pad(w_score, ((0, 0), (0, ph))).astype(jnp.bfloat16)
    ws_p = ws_p.reshape(1, 1, H_pad)                                       # (1,1,H_pad)

    # ---- tile selection ----------------------------------------------------
    # L tile: full extent if small (always a legal block), else 1024 (mult of 8/128).
    TL = L if L <= 1024 else 1024
    nL = pl.cdiv(L, TL)
    if TL % 8 != 0:
        TB = 1                       # keep in-kernel reshapes layout-free
    else:
        # Target a few hundred KiB .. ~1 MiB of streamed f32 embeddings per step,
        # while bounding the (TB*TL, H_pad) intermediate to <= 4096 rows.
        rows_target = max(TL, min(4096, (1 << 20) // max(1, I * 4)))
        TB = max(1, min(B, rows_target // TL))
    # Make sure the grid has >= 2 steps when possible (megacore / pipelining).
    while TB > 1 and pl.cdiv(B, TB) * nL < 2:
        TB = max(1, TB // 2)
    nB = pl.cdiv(B, TB)

    x_spec = pl.BlockSpec((TB, TL, I), lambda b, l: (b, l, 0))
    # W_e / ws are tiny (I*H_pad bf16) and VMEM-resident; double-buffering them
    # costs ~nothing, so no pipeline_mode override is needed here.
    we_spec = pl.BlockSpec((I, H_pad), lambda b, l: (0, 0))
    bias_spec = pl.BlockSpec((TB, 1, H_pad), lambda b, l: (b, 0, 0))
    ws_spec = pl.BlockSpec((1, 1, H_pad), lambda b, l: (0, 0, 0))
    out_spec = pl.BlockSpec((TB, 1, TL), lambda b, l: (b, 0, l))

    if num_mask is not None:
        kernel = _score_kernel_masked
        mask = num_mask.reshape(B, 1, L).astype(jnp.int8)
        in_specs = [x_spec, we_spec, bias_spec, ws_spec,
                    pl.BlockSpec((TB, 1, TL), lambda b, l: (b, 0, l))]
        args = (num_embeddings, we_p, bias_p, ws_p, mask)
        mask_bytes = B * L
    else:
        kernel = _score_kernel
        in_specs = [x_spec, we_spec, bias_spec, ws_spec]
        args = (num_embeddings, we_p, bias_p, ws_p)
        mask_bytes = 0

    cost = pl.CostEstimate(
        flops=2 * B * L * I * H_pad + 2 * B * L * H_pad,
        transcendentals=B * L * H_pad,
        bytes_accessed=(B * L * I * 4          # f32 embeddings (streamed once)
                        + I * H_pad * 2        # bf16 W_e
                        + B * H_pad * 4        # f32 per-batch bias
                        + H_pad * 2            # bf16 score row
                        + mask_bytes           # int8 mask (masked path only)
                        + B * L * 4),          # f32 output
    )

    out = pl.pallas_call(
        kernel,
        out_shape=jax.ShapeDtypeStruct((B, 1, L), jnp.float32),
        grid=(nB, nL),
        in_specs=in_specs,
        out_specs=out_spec,
        compiler_params=pltpu.CompilerParams(
            dimension_semantics=("parallel", "parallel"),
            vmem_limit_bytes=32 * 1024 * 1024),
        cost_estimate=cost,
    )(*args)

    return out.reshape(B, L)


def _reference(hidden, num_embeddings, w_attn, b_attn, w_score, num_mask=None):
    # Pure-JAX f32 reference following the PyTorch module exactly.
    B, _, H = hidden.shape
    _, L, I = num_embeddings.shape
    hidden_rep = jnp.broadcast_to(hidden, (B, L, H))
    energy_in = jnp.concatenate([hidden_rep, num_embeddings], axis=2).reshape(-1, H + I)
    s = jnp.tanh(energy_in @ w_attn.T + b_attn) @ w_score.T
    s = s.reshape(B, L)
    if num_mask is not None:
        s = jnp.where(num_mask, jnp.float32(-1e12), s)
    return s


if __name__ == "__main__":
    # Small, module-consistent shapes.
    B, L = 2, 8
    input_size, hidden_size = 32, 32
    D = input_size + hidden_size

    key = jax.random.PRNGKey(0)
    k_h, k_e, k_wa, k_ba, k_ws, k_m = jax.random.split(key, 6)

    hidden = jax.random.normal(k_h, (B, 1, hidden_size), dtype=jnp.float32)
    num_embeddings = jax.random.normal(k_e, (B, L, input_size), dtype=jnp.float32)

    # Deterministic parameter init (PyTorch-Linear-style uniform bounds).
    bound_attn = 1.0 / (D ** 0.5)
    w_attn = jax.random.uniform(k_wa, (hidden_size, D), jnp.float32,
                                -bound_attn, bound_attn)
    b_attn = jax.random.uniform(k_ba, (hidden_size,), jnp.float32,
                                -bound_attn, bound_attn)
    bound_score = 1.0 / (hidden_size ** 0.5)
    w_score = jax.random.uniform(k_ws, (1, hidden_size), jnp.float32,
                                 -bound_score, bound_score)

    num_mask = jax.random.bernoulli(k_m, 0.25, (B, L))

    # Masked path.
    out_m = score_forward(hidden, num_embeddings, w_attn, b_attn, w_score, num_mask)
    out_m = jax.block_until_ready(out_m)
    ref_m = _reference(hidden, num_embeddings, w_attn, b_attn, w_score, num_mask)
    assert out_m.shape == (B, L)
    # bf16 MXU inputs with f32 accumulation -> loosened tolerance vs f32 reference.
    assert jnp.allclose(out_m, ref_m, atol=3e-2, rtol=3e-2), (out_m, ref_m)

    # No-mask path (specialized kernel with no mask input).
    out_n = score_forward(hidden, num_embeddings, w_attn, b_attn, w_score, None)
    out_n = jax.block_until_ready(out_n)
    ref_n = _reference(hidden, num_embeddings, w_attn, b_attn, w_score, None)
    assert out_n.shape == (B, L)
    assert jnp.allclose(out_n, ref_n, atol=3e-2, rtol=3e-2), (out_n, ref_n)

    print("KERNEL_OK")
</pallas_src>

<mosaic_0001>
module attributes {stable_mosaic.version = 11 : i64} {
  func.func @_score_kernel_masked(%arg0: i32, %arg1: i32, %arg2: memref<1x8x32xf32, #tpu.memory_space<vmem>>, %arg3: memref<32x128xbf16, #tpu.memory_space<vmem>>, %arg4: memref<1x1x128xf32, #tpu.memory_space<vmem>>, %arg5: memref<1x1x128xbf16, #tpu.memory_space<vmem>>, %arg6: memref<1x1x8xi8, #tpu.memory_space<vmem>>, %arg7: memref<1x1x8xf32, #tpu.memory_space<vmem>>) attributes {dimension_semantics = [#tpu.dimension_semantics<parallel>, #tpu.dimension_semantics<parallel>], iteration_bounds = array<i64: 2, 1>, scalar_prefetch = 0 : i64, scratch_operands = 0 : i64, tpu.core_type = #tpu.core_type<tc>, window_params = [{transform_indices = @transform_0, window_bounds = array<i64: 1, 8, 32>}, {pipeline_mode = #tpu.pipeline_mode<synchronous>, transform_indices = @transform_1, window_bounds = array<i64: 32, 128>}, {transform_indices = @transform_2, window_bounds = array<i64: 1, 1, 128>}, {pipeline_mode = #tpu.pipeline_mode<synchronous>, transform_indices = @transform_3, window_bounds = array<i64: 1, 1, 128>}, {transform_indices = @transform_4, window_bounds = array<i64: 1, 1, 8>}, {transform_indices = @transform_5, window_bounds = array<i64: 1, 1, 8>}]} {
    %c0 = arith.constant 0 : index
    %c0_0 = arith.constant 0 : index
    %c0_1 = arith.constant 0 : index
    %0 = vector.load %arg2[%c0, %c0_0, %c0_1] : memref<1x8x32xf32, #tpu.memory_space<vmem>>, vector<1x8x32xf32>
    %1 = arith.truncf %0 : vector<1x8x32xf32> to vector<1x8x32xbf16>
    %2 = vector.shape_cast %1 : vector<1x8x32xbf16> to vector<8x32xbf16>
    %c0_2 = arith.constant 0 : index
    %c0_3 = arith.constant 0 : index
    %3 = vector.load %arg3[%c0_2, %c0_3] : memref<32x128xbf16, #tpu.memory_space<vmem>>, vector<32x128xbf16>
    %cst = arith.constant dense<0.000000e+00> : vector<8x128xf32>
    %4 = tpu.matmul %2, %3, %cst {dimension_numbers = #tpu.dot_dimension_numbers<[1], [0], [0], [1], [0, 0, 1, 1], [], []>} : vector<8x32xbf16>, vector<32x128xbf16>, vector<8x128xf32> -> vector<8x128xf32>
    %5 = vector.shape_cast %4 : vector<8x128xf32> to vector<1x8x128xf32>
    %c0_4 = arith.constant 0 : index
    %c0_5 = arith.constant 0 : index
    %c0_6 = arith.constant 0 : index
    %6 = vector.load %arg4[%c0_4, %c0_5, %c0_6] : memref<1x1x128xf32, #tpu.memory_space<vmem>>, vector<1x1x128xf32>
    %7 = vector.broadcast %6 : vector<1x1x128xf32> to vector<1x8x128xf32>
    %8 = arith.addf %5, %7 : vector<1x8x128xf32>
    %9 = math.tanh %8 : vector<1x8x128xf32>
    %10 = arith.truncf %9 : vector<1x8x128xf32> to vector<1x8x128xbf16>
    %c0_7 = arith.constant 0 : index
    %c0_8 = arith.constant 0 : index
    %c0_9 = arith.constant 0 : index
    %11 = vector.load %arg5[%c0_7, %c0_8, %c0_9] : memref<1x1x128xbf16, #tpu.memory_space<vmem>>, vector<1x1x128xbf16>
    "tpu.trace_start"() <{level = 10 : i32, message = "bqh,bkh->bqk"}> : () -> ()
    %cst_10 = arith.constant dense<0.000000e+00> : vector<1x1x8xf32>
    %12 = tpu.matmul %11, %10, %cst_10 {dimension_numbers = #tpu.dot_dimension_numbers<[2], [2], [1], [1], [0, 0, 0, 1, 1, 1], [0], [0]>} : vector<1x1x128xbf16>, vector<1x8x128xbf16>, vector<1x1x8xf32> -> vector<1x1x8xf32>
    "tpu.trace_stop"() : () -> ()
    %c0_11 = arith.constant 0 : index
    %c0_12 = arith.constant 0 : index
    %c0_13 = arith.constant 0 : index
    %13 = vector.load %arg6[%c0_11, %c0_12, %c0_13] : memref<1x1x8xi8, #tpu.memory_space<vmem>>, vector<1x1x8xi8>
    %c0_i8 = arith.constant 0 : i8
    %14 = vector.broadcast %c0_i8 : i8 to vector<1x1x8xi8>
    %15 = arith.cmpi ne, %13, %14 : vector<1x1x8xi8>
    %cst_14 = arith.constant -9.99999995E+11 : f32
    %16 = vector.broadcast %cst_14 : f32 to vector<1x1x8xf32>
    %17 = arith.select %15, %16, %12 : vector<1x1x8xi1>, vector<1x1x8xf32>
    %c0_15 = arith.constant 0 : index
    %c0_16 = arith.constant 0 : index
    %c0_17 = arith.constant 0 : index
    %18 = vector.load %arg7[%c0_15, %c0_16, %c0_17] : memref<1x1x8xf32, #tpu.memory_space<vmem>>, vector<1x1x8xf32>
    tpu.vector_store %arg7[%c0_15, %c0_16, %c0_17], %17 {strides = array<i32>} : memref<1x1x8xf32, #tpu.memory_space<vmem>>, vector<1x1x8xf32>,
    return
  }
  func.func @transform_0(%arg0: i32, %arg1: i32) -> (i32, i32, i32) {
    %c0_i32 = arith.constant 0 : i32
    %c0_i32_0 = arith.constant 0 : i32
    return %arg0, %arg1, %c0_i32 : i32, i32, i32
  }
  func.func @transform_1(%arg0: i32, %arg1: i32) -> (i32, i32) {
    %c0_i32 = arith.constant 0 : i32
    %c0_i32_0 = arith.constant 0 : i32
    %c0_i32_1 = arith.constant 0 : i32
    return %c0_i32, %c0_i32_0 : i32, i32
  }
  func.func @transform_2(%arg0: i32, %arg1: i32) -> (i32, i32, i32) {
    %c0_i32 = arith.constant 0 : i32
    %c0_i32_0 = arith.constant 0 : i32
    %c0_i32_1 = arith.constant 0 : i32
    return %arg0, %c0_i32, %c0_i32_0 : i32, i32, i32
  }
  func.func @transform_3(%arg0: i32, %arg1: i32) -> (i32, i32, i32) {
    %c0_i32 = arith.constant 0 : i32
    %c0_i32_0 = arith.constant 0 : i32
    %c0_i32_1 = arith.constant 0 : i32
    %c0_i32_2 = arith.constant 0 : i32
    return %c0_i32, %c0_i32_0, %c0_i32_1 : i32, i32, i32
  }
  func.func @transform_4(%arg0: i32, %arg1: i32) -> (i32, i32, i32) {
    %c0_i32 = arith.constant 0 : i32
    %c0_i32_0 = arith.constant 0 : i32
    return %arg0, %c0_i32, %arg1 : i32, i32, i32
  }
  func.func @transform_5(%arg0: i32, %arg1: i32) -> (i32, i32, i32) {
    %c0_i32 = arith.constant 0 : i32
    %c0_i32_0 = arith.constant 0 : i32
    return %arg0, %c0_i32, %arg1 : i32, i32, i32
  }
}

</mosaic_0001>

<bundles_post_ra>
// kernel: tpu_custom_call.1
= control target key start
LH: loop header
LB: loop body
LE: loop exit
PB: predicated region body
PF: predicated region fallthrough
CT: control target
= control target key end

     0   :  { %s1042_s0 = inlined_call_operand.hbm [shape: f32[2,8,32], index: 0, kind: input, shape index: {}]   ;;  %s1043_s1 = inlined_call_operand.hbm [shape: bf16[32,128], index: 1, kind: input, shape index: {}]   ;;  %s1044_s2 = inlined_call_operand.vmem [shape: f32[2,1,128], index: 2, kind: input, shape index: {}]   ;;  %s1045_s3 = inlined_call_operand.vmem [shape: bf16[1,1,128], index: 3, kind: input, shape index: {}]   ;;  %s1046_s4 = inlined_call_operand.vmem [shape: s8[2,1,8], index: 4, kind: input, shape index: {}]   ;;  %s1047_s5 = inlined_call_operand.hbm [shape: f32[2,1,8], index: 5, kind: output, shape index: {}]  }
   0x1   :  { %1050 = sst [smem:[#allocation12_spill]] %s1043_s1 }
   0x2   :  { %10 = vsyncpa [#allocation3], 0 }
   0x3   :  { %12 = vsyncpa [#allocation3 + $0x1], 0 }
   0x4   :  { %13 = vsyncpa [#allocation6], 0 }
   0x5   :  { %14 = vsyncpa [#allocation4], 0 }
   0x6   :  { %16 = vsyncpa [#allocation4 + $0x1], 0  ;;  %s851_s18 = smov 0   ;;  %s853_s19 = smov 0  }
   0x7   :  { %s855_s20 = smov 0   ;;  %s857_s21 = smov 0  }
   0x8   :  { %s859_s22 = smov 0   ;;  %s861_s23 = smov 0  }
   0x9 LB: > { %s555_s24 = sadd.s32 4294967295, %s811_s23   ;;  %s556_s25 = sadd.s32 4294967294, %s811_s23   ;;  %s811_s23 = sphi %s861_s23, %s22_s23   ;;  %s807_s22 = sphi %s859_s22, %s1070_s22   ;;  %s803_s21 = sphi %s857_s21, %s1069_s21   ;;  %s799_s20 = sphi %s855_s20, %s1068_s20   ;;  %s795_s19 = sphi %s853_s19, %s1067_s19   ;;  %s791_s18 = sphi %s851_s18, %s1066_s18  }
   0xa   : > { %p56_p0 = scmp.ne.s32.totalorder %s795_s19, %s791_s18  ;;  %p885_p1 = scmp.eq.s32.totalorder %s555_s24, 0 }
   0xb   : > { %p889_p2 = scmp.eq.s32.totalorder %s555_s24, 1  ;;  %p184_p3 = scmp.eq.s32.totalorder %s556_s25, 1 }
   0xc   : > { %p895_p4 = por %p885_p1, %p56_p0  ;;  %p557_p5 = scmp.ge.s32.totalorder %s811_s23, 1 }
   0xd   : > { %p900_p6 = por %p184_p3, %p56_p0  ;;  %p191_p7 = scmp.lt.s32.totalorder %s811_s23, 3 }
   0xe   : > { %s1053_s28 = scalar_select %p895_p4, 1, 0 }
   0xf   : > { %s1054_s29 = scalar_select %p900_p6, 1, 0 }
  0x10   : > { %p905_p8 = pnand %p557_p5, %p191_p7  ;;  %s813_s6 = smov [#allocation5]  }
  0x11   : > { %s203_s7 = sshll.u32 %s813_s6, 4  ;;  %s34_s9 = sadd.s32 1, %s807_s22  ;;  %s204_s7 = int_to_ptr.vmem [resolvable:$true] %s203_s7 }
  0x12   : > { %p599_p9 = pneg %p905_p8  ;;  %s684_s10 = scalar_lea.vmem %s204_s7, 256 }
  0x13   : > { %p685_p13 = scmp.ne.s32.totalorder %s204_s7, %s684_s10  ;;  %p692_p5 = scmp.lt.s32.totalorder %s204_s7, %s204_s7 }
  0x14   : > { %p914_p11 = pnand %p599_p9, %p885_p1  ;;  %p693_p7 = scmp.lt.s32.totalorder %s684_s10, %s684_s10 }
  0x16   : > { %p675_p12 = pneg %p914_p11  ;;  %p694_p6 = por %p693_p7, %p692_p5 }
  0x18   : > { %p687_p0 = pnand %p685_p13, %p675_p12 }
  0x1a   : > { %p688_p3 = pneg %p687_p0 }
  0x1c   : > { %p695_p4 = pnand %p694_p6, %p688_p3 }
  0x1e   : > { %698 = shalt.err (!%p695_p4)
}
  0x1f   : > { %s814_s11 = smov 64   ;;  %s815_s12 = smov 4  }
  0x20   : > { %s1057_s1 = sld [smem:[#allocation12_spill]]  ;;  %p36_p6 = scmp.ge.s32.totalorder %s34_s9, 2 }
  0x21   : > { %s43_s15 = sadd.s32 1, %s799_s20  ;;  %p50_p4 = scmp.ne.s32.totalorder %s799_s20, %s795_s19 }
  0x22   : > { %p51_p9 = scmp.eq.s32.totalorder %s811_s23, 0  ;;  %s1072_s9 = smov (%p36_p6, %s34_s9), 0 }
  0x23   : > { %1058 = sst [smem:[#allocation11_spill]] %s1072_s9  ;;  %p938_p13 = por %p889_p2, %p50_p4 }
  0x24   : > { %p932_p12 = por %p51_p9, %p50_p4  ;;  %s38_s24 = ssub.s32 %s807_s22, %s1072_s9 }
  0x25   : > { %p612_p0 = scmp.lt.s32.totalorder %s811_s23, 2  ;;  %s220_s25 = sand.u32 1, %s799_s20  }
  0x26   : > { %602 = dma.hbm_to_vmem [thread:$0]  (!%p914_p11), %s1057_s1, 256, %s204_s7, [#allocation6], %s814_s11, %s814_s11, %s815_s12  }
  0x27   : > { %p41_p11 = scmp.eq.s32.totalorder %s38_s24, 0  ;;  %s560_s6 = sshll.u32 %s220_s25, 3 }
  0x28   : > { %s561_s8 = sshll.u32 %s807_s22, 7  ;;  %s224_s13 = scalar_lea.vmem [#allocation2], %s560_s6 }
  0x29   : > { %s947_s7 = scalar_select %p41_p11, %s799_s20, %s43_s15  }
  0x2a   : > { %s230_s12 = scalar_lea.hbm %s1042_s0, %s561_s8  ;;  %s232_s14 = sshll.u32 %s224_s13, 4  ;;  %s233_s14 = int_to_ptr.vmem [resolvable:$true] %s232_s14 }
  0x2b   : > { %p955_p2 = pnand %p612_p0, %p932_p12  ;;  %s221_s1 = scalar_lea.sflag [#allocation3], %s220_s25 }
  0x2c   : > { %s712_s24 = scalar_lea.vmem %s233_s14, 128  ;;  %s816_s15 = smov [#allocation2]  }
  0x2d   : > { %p701_p3 = pneg %p955_p2  ;;  %p713_p5 = scmp.ne.s32.totalorder %s233_s14, %s712_s24 }
  0x2e   : > { %s717_s9 = sshll.u32 %s816_s15, 4  ;;  %s718_s9 = int_to_ptr.vmem [resolvable:$false] %s717_s9 }
  0x2f   : > { %p715_p7 = pnand %p713_p5, %p701_p3  ;;  %s719_s8 = scalar_lea.vmem %s718_s9, 256 }
  0x30   : > { %p720_p4 = scmp.lt.s32.totalorder %s233_s14, %s718_s9  ;;  %p721_p9 = scmp.lt.s32.totalorder %s719_s8, %s712_s24 }
  0x31   : > { %p716_p6 = pneg %p715_p7 }
  0x32   : > { %p722_p11 = por %p721_p9, %p720_p4 }
  0x34   : > { %p723_p10 = pnand %p722_p11, %p716_p6 }
  0x36   : > { %726 = shalt.err (!%p723_p10)
}
  0x37   : > { %606 = dma.hbm_to_vmem [thread:$0]  (!%p955_p2), %s230_s12, 128, %s233_s14, %s221_s1  }
  0x38   : > { %256 = sbr.rel (%p905_p8) target bundleno = 501 (0x1f5), region = 40  ;;  %s966_s16 = sand.u32 (!%p905_p8), 1, %s795_s19  }
  0x39   : > { %s563_s25 = sshll.u32 (!%p905_p8), %s966_s16, 3  ;;  %s259_s6 = scalar_lea.sflag (!%p905_p8), [#allocation3], %s966_s16 }
  0x3a   : > { %s262_s10 = scalar_lea.vmem (!%p905_p8), [#allocation2], %s563_s25  ;;  %p1062_p12 = scmp.ne.s32.totalorder (!%p905_p8), %s1053_s28, 0 }
  0x3d   : > { %778 = dma.done.wait (%p1062_p12), %s259_s6, 128  }
  0x3e   : > { %780 = vsyncadd (%p1062_p12), %s259_s6, 4294967168 }
  0x3f   : > { %782 = dma.done.wait (%p885_p1), [#allocation6], 256  }
  0x40   : > { %784 = vsyncadd (%p885_p1), [#allocation6], 4294967040  ;;  %v817_v0 = vmov 0.0   ;;  %vm818_vm0 = vmmov 0   ;;  %v669_v1 = vld [vmem:[#allocation5 + $0x8] sm:$0xff]   ;;  %v670_v2 = vld [vmem:[#allocation5] sm:$0xff]  }
  0x41   : > { %577 = vmatprep.subr.bf16.mxu0 %v817_v0  ;;  %581 = vmatprep.mubr.msk.bf16.mxu0 %vm818_vm0, %v817_v0  ;;  %v313_v3 = vld [vmem:[%s262_s10] sm:$0xff]  ;;  %vm331_vm1 = vcmask 261120   ;;  %p301_p8 = scmp.lt.s32.totalorder %s803_s21, 1  ;;  %v819_v15 = vmov 0   ;;  %s569_s27 = sshll.u32 %s803_s21, 4  ;;  %vm432_vm4 = vcmask 57344  }
  0x42   : > { %585 = vmatprep.subr.bf16.mxu1 %v817_v0  ;;  %587 = vmatprep.mubr.msk.bf16.mxu1 %vm818_vm0, %v817_v0  ;;  %v314_v4 = vpack.c.bf16 %v313_v3, %v313_v3  ;;  %v385_v13 = vld [vmem:[%s1045_s3] sm:$0x1]  ;;  %s300_s24 = scalar_lea.vmem [#allocation7], %s966_s16  ;;  %s994_s6 = scalar_lea.hbm %s1047_s5, %s569_s27 }
  0x43   : > { %578 = vmatpush3.bf16.msra.mxu0 %v669_v1  ;;  %s302_s1 = scalar_select %p301_p8, %s803_s21, 1 }
  0x44   : > { %579 = vmatprep.subr.bf16.mxu0 %v817_v0  ;;  %s448_s15 = sshll.u32 %s300_s24, 4  ;;  %s435_s10 = scalar_lea.sflag [#allocation4], %s966_s16  ;;  %s996_s15 = int_to_ptr.vmem [resolvable:$true] %s448_s15 }
  0x45   : > { %s303_s30 = scalar_lea.vmem %s1044_s2, %s302_s1  ;;  %s309_s14 = scalar_lea.vmem %s1046_s4, %s302_s1 }
  0x46   : > { %v568_v5 = vld [vmem:[%s303_s30] ss:$0 sm:$0xff]  ;;  %s727_s21 = scalar_lea.vmem %s996_s15, 16  ;;  %s820_s1 = smov [#allocation7]  }
  0x47   : > { %580 = vmatpush3.bf16.msra.mxu0 %v670_v2  ;;  %v426_v14 = vld [vmem:[%s309_s14] sm:$0x1]  ;;  %p728_p1 = scmp.ne.s32.totalorder %s996_s15, %s727_s21  ;;  %s731_s26 = sshll.u32 %s820_s1, 4  ;;  %s732_s26 = int_to_ptr.vmem [resolvable:$false] %s731_s26 }
  0x48   : > { %vm427_vm2 = vnez %v426_v14  ;;  %s733_s28 = scalar_lea.vmem %s732_s26, 32  ;;  %p734_p2 = scmp.lt.s32.totalorder %s996_s15, %s732_s26 }
  0x49   : > { %v428_v16 = vsel %vm427_vm2, 16843009, %v819_v15  ;;  %p729_p10 = pnand %p728_p1, %p938_p13  ;;  %p735_p3 = scmp.lt.s32.totalorder %s733_s28, %s727_s21 }
  0x4a   : > { %582 = vmatmul.mubr.msk.bf16.vlgmr.msra.gmra.mxu0 %vm331_vm1, %v314_v4  ;;  %v429_v17 = vunpack.c.0.s8 %v428_v16 }
  0x4b   : > { %p730_p0 = pneg %p729_p10  ;;  %p736_p5 = por %p735_p3, %p734_p2 }
  0x4c   : > { %vm430_vm3 = vcmp.ne.s32.totalorder %v429_v17, 0 }
  0x4d   : > { %p737_p7 = pnand %p736_p5, %p730_p0 }
 0x10a   : > { %v369_v6 = vpop.f32.mrf.mxu0 }
 0x10b   : > { %v382_v7 = vadd.f32 %v568_v5, %v369_v6 }
 0x10c   : > { %v583_v8 = vpop.f32.mrf.mxu0 }
 0x10d   : > { %671 = vtanh.f32 %v382_v7 }
 0x10e   : > { %v372_v9 = vpop.f32.mrf.mxu0 }
 0x110   : > { %v584_v10 = vpop.f32.mrf.mxu0 }
 0x11a   : > { %v672_v11 = vpop.eup %671 }
 0x11b   : > { %v384_v12 = vpack.c.bf16 %v672_v11, %v672_v11 }
 0x11d   : > { %586 = vmatpush3.bf16.xpose.msra.mxu1 %v384_v12 }
 0x124   : > { %588 = vmatmul.mubr.bf16.vlgmr.msra.gmra.mxu1 %v385_v13 }
 0x1e4   : > { %v420_v18 = vpop.f32.mrf.mxu1 }
 0x1e5   : > { %v431_v19 = vsel %vm430_vm3, -1e+12, %v420_v18 }
 0x1e6   : > { %433 = vst.msk [vmem:[%s300_s24] sm:$0x1] %vm432_vm4, %v431_v19  ;;  %v589_v20 = vpop.f32.mrf.mxu1 }
 0x1e7   : > { %740 = shalt.err (!%p737_p7)
}
 0x1e8   : > { %s741_s30 = scalar_lea.hbm %s994_s6, 16  ;;  %s745_s11 = scalar_lea.hbm %s1047_s5, 32 }
 0x1e9   : > { %p742_p6 = scmp.ne.s32.totalorder %s994_s6, %s741_s30  ;;  %p746_p11 = scmp.lt.s32.totalorder %s994_s6, %s1047_s5 }
 0x1ea   : > { %p747_p12 = scmp.lt.s32.totalorder %s745_s11, %s741_s30 }
 0x1eb   : > { %p743_p4 = pnand %p742_p6, %p938_p13 }
 0x1ec   : > { %p748_p8 = por %p747_p12, %p746_p11 }
 0x1ed   : > { %p744_p9 = pneg %p743_p4 }
 0x1ef   : > { %p749_p1 = pnand %p748_p8, %p744_p9 }
 0x1f1   : > { %752 = shalt.err (!%p749_p1)
}
 0x1f2   : > { %597 = dma.vmem_to_hbm [thread:$0]  (%p938_p13), %s996_s15, 16, %s994_s6, %s435_s10   ;;  %v423_v21 = vpop.f32.mrf.mxu1 }
 0x1f4   : > { %v590_v22 = vpop.f32.mrf.mxu1 }
 0x1f5 PF: > { %s460_s14 = sand.u32 1, %s791_s18   ;;  %p1063_p10 = scmp.ne.s32.totalorder %s1054_s29, 0 }
 0x1f6   : > { %p1064_p0 = scmp.ge.s32.totalorder %s811_s23, 2  ;;  %s461_s27 = scalar_lea.sflag [#allocation4], %s460_s14 }
 0x1f8   : > { %p608_p2 = pnand %p1064_p0, %p1063_p10 }
 0x1fa   : > { %p609_p3 = pneg %p608_p2 }
 0x1fc   : > { %786 = dma.done.wait (%p609_p3), %s461_s27, 16  }
 0x1fd   : > { %788 = vsyncadd (%p609_p3), %s461_s27, 4294967280  ;;  %s22_s23 = sadd.s32 1, %s811_s23   ;;  %s1065_s17 = sld [smem:[#allocation11_spill]] }
 0x1fe   : > { %p19_p5 = scmp.ge.s32.totalorder %s22_s23, 4   ;;  %s1066_s18 = smov %s795_s19 }
 0x1ff   : > { %s1067_s19 = smov %s799_s20  ;;  %s1068_s20 = smov %s947_s7 }
 0x200   : > { %s1069_s21 = smov %s807_s22  ;;  %21 = sbr.rel (!%p19_p5) target bundleno = 9 (0x9), region = 95 }
 0x203   : > { %s1070_s22 = smov %s1065_s17 }
 0x205   :  { %465 = vsyncpa [#allocation3], 1 }
 0x206   :  { %467 = vsyncpa [#allocation3 + $0x1], 1 }
 0x207   :  { %468 = vsyncpa [#allocation6], 1 }
 0x208   :  { %469 = vsyncpa [#allocation4], 1 }
 0x209   :  { %471 = vsyncpa [#allocation4 + $0x1], 1 }

</bundles_post_ra>
